<compile_context>
chip_gen: v6e
topology: v6e:2x2x1
jax: 0.10.0
libtpu: 0.0.40
codegen_flags: <defaults>
</compile_context>

<pallas_src>
import functools
import math

import jax
import jax.numpy as jnp
from jax.experimental import pallas as pl
from jax.experimental.pallas import tpu as pltpu

HL_SIZE = 512


def _round_up(x, m):
    return ((x + m - 1) // m) * m


def _full_spec(shape):
    """Whole-array block (last two dims equal full array dims -> always legal)."""
    return pl.BlockSpec(shape, lambda i: (0,) * len(shape))


# --------------------------------------------------------------------------
# Pallas kernels
# --------------------------------------------------------------------------
def _matmul_bias_act_kernel(x_ref, w_ref, b_ref, o_ref, *, relu):
    y = jnp.dot(x_ref[...], w_ref[...], preferred_element_type=jnp.float32)
    y = y + b_ref[...]
    if relu:
        y = jnp.maximum(y, 0.0)
    o_ref[...] = y.astype(o_ref.dtype)


def linear_pallas(x, w, b, *, relu, out_dtype):
    """y = act(x @ w + b).  x:(M,K) bf16, w:(K,N) bf16, b:(1,N) f32."""
    M, K = x.shape
    K2, N = w.shape
    assert K == K2 and b.shape == (1, N)
    return pl.pallas_call(
        functools.partial(_matmul_bias_act_kernel, relu=relu),
        out_shape=jax.ShapeDtypeStruct((M, N), out_dtype),
        grid=(1,),
        in_specs=[_full_spec((M, K)), _full_spec((K, N)), _full_spec((1, N))],
        out_specs=_full_spec((M, N)),
        compiler_params=pltpu.CompilerParams(dimension_semantics=("arbitrary",)),
    )(x, w, b)


def _mlp_head_kernel(x_ref, wi_ref, bi_ref, w1_ref, b1_ref, wo_ref, bo_ref, o_ref):
    # fc_in -> ReLU -> fc1 -> ReLU -> fc_out, fully fused; bf16 MXU, f32 accum.
    h = jnp.dot(x_ref[...], wi_ref[...], preferred_element_type=jnp.float32) + bi_ref[...]
    h = jnp.maximum(h, 0.0).astype(jnp.bfloat16)
    h = jnp.dot(h, w1_ref[...], preferred_element_type=jnp.float32) + b1_ref[...]
    h = jnp.maximum(h, 0.0).astype(jnp.bfloat16)
    y = jnp.dot(h, wo_ref[...], preferred_element_type=jnp.float32) + bo_ref[...]
    o_ref[...] = y.astype(o_ref.dtype)


def mlp_head_pallas(x, w_in, b_in, w1, b1, w_out, b_out):
    Bp, Din = x.shape
    H = w_in.shape[1]
    Ap = w_out.shape[1]
    shapes = [(Bp, Din), (Din, H), (1, H), (H, H), (1, H), (H, Ap), (1, Ap)]
    return pl.pallas_call(
        _mlp_head_kernel,
        out_shape=jax.ShapeDtypeStruct((Bp, Ap), jnp.float32),
        grid=(1,),
        in_specs=[_full_spec(s) for s in shapes],
        out_specs=_full_spec((Bp, Ap)),
        compiler_params=pltpu.CompilerParams(dimension_semantics=("arbitrary",)),
    )(x, w_in, b_in, w1, b1, w_out, b_out)


# --------------------------------------------------------------------------
# Conv2d as NHWC im2col (XLA glue, inside jit) + Pallas matmul kernel
# --------------------------------------------------------------------------
def _im2col_nhwc(x, K, stride):
    """x: (B, H, W, C) NHWC -> (B*Ho*Wo, K*K*C), columns in (kh, kw, c) order."""
    B, H, W, C = x.shape
    Ho = (H - K) // stride + 1
    Wo = (W - K) // stride + 1
    cols = []
    for kh in range(K):
        for kw in range(K):
            cols.append(x[:, kh:kh + stride * Ho:stride, kw:kw + stride * Wo:stride, :])
    p = jnp.stack(cols, axis=3)                         # (B, Ho, Wo, K*K, C)
    return p.reshape(B * Ho * Wo, K * K * C), Ho, Wo


def conv2d_relu(x_nhwc, w_mm, b, *, K, stride):
    """PyTorch Conv2d + ReLU on NHWC input. w_mm: (K*K*Cin, Cout) bf16."""
    B = x_nhwc.shape[0]
    Cout = w_mm.shape[1]
    p, Ho, Wo = _im2col_nhwc(x_nhwc, K, stride)
    y = linear_pallas(p, w_mm, b, relu=True, out_dtype=jnp.bfloat16)
    return y.reshape(B, Ho, Wo, Cout)


# --------------------------------------------------------------------------
# Jitted forward passes (one compiled program per task kind)
# --------------------------------------------------------------------------
@functools.partial(jax.jit, static_argnames=("a_dim",))
def _forward_vector(obs, w_in, b_in, w1, b1, w_out, b_out, *, a_dim):
    B, S = obs.shape
    Kp = w_in.shape[0]                       # lane-padded input dim
    Bp = _round_up(B, 8)
    x = jnp.zeros((Bp, Kp), jnp.bfloat16).at[:B, :S].set(obs.astype(jnp.bfloat16))
    y = mlp_head_pallas(x, w_in, b_in, w1, b1, w_out, b_out)
    return y[:B, :a_dim]


@functools.partial(jax.jit, static_argnames=("a_dim",))
def _forward_image(obs, c1w, c1b, c2w, c2b, c3w, c3b, lw, lb,
                   w1, b1, w_out, b_out, *, a_dim):
    B = obs.shape[0]
    x = jnp.transpose(obs, (0, 2, 3, 1)).astype(jnp.bfloat16)   # NCHW -> NHWC once
    x = conv2d_relu(x, c1w, c1b, K=8, stride=4)                 # (B, 19, 19, 32)
    x = conv2d_relu(x, c2w, c2b, K=4, stride=2)                 # (B,  8,  8, 64)
    x = conv2d_relu(x, c3w, c3b, K=3, stride=1)                 # (B,  6,  6, 64)
    feat = x.reshape(B, -1)                                     # (B, 2304) (H,W,C) order
    Bp = _round_up(B, 8)
    xh = jnp.zeros((Bp, feat.shape[1]), jnp.bfloat16).at[:B, :].set(feat)
    y = mlp_head_pallas(xh, lw, lb, w1, b1, w_out, b_out)
    return y[:B, :a_dim]


# --------------------------------------------------------------------------
# Parameter init (deterministic, PyTorch-default-style uniform bounds)
# --------------------------------------------------------------------------
def _init_linear(key, fan_in, fan_out):
    kw, kb = jax.random.split(key)
    bound = 1.0 / math.sqrt(fan_in)
    w = jax.random.uniform(kw, (fan_in, fan_out), jnp.float32, -bound, bound)
    b = jax.random.uniform(kb, (1, fan_out), jnp.float32, -bound, bound)
    return w, b


def _init_conv(key, cin, cout, k):
    kw, kb = jax.random.split(key)
    fan_in = cin * k * k
    bound = 1.0 / math.sqrt(fan_in)
    w = jax.random.uniform(kw, (cout, cin, k, k), jnp.float32, -bound, bound)
    b = jax.random.uniform(kb, (1, cout), jnp.float32, -bound, bound)
    return w, b


def _conv_to_matmul_layout(w):
    """(Cout, Cin, K, K) -> (K*K*Cin, Cout) bf16, matching im2col (kh, kw, c) order."""
    Cout, Cin, K, _ = w.shape
    return jnp.transpose(w, (2, 3, 1, 0)).reshape(K * K * Cin, Cout).astype(jnp.bfloat16)


# --------------------------------------------------------------------------
# ValueNet (JAX / Pallas port of the PyTorch module)
# --------------------------------------------------------------------------
class ValueNetPallas:
    def __init__(self, key):
        self.task_ids = []
        self.curr_task_id = -1
        self.task_shapes = {}
        self.fc_ins = {}
        self.fc_outs = {}
        self.a_dims = {}
        self.hl_size = HL_SIZE
        k1, self._key = jax.random.split(key)
        w, b = _init_linear(k1, HL_SIZE, HL_SIZE)       # shared fc1, as in PyTorch
        self.fc1_w = w.astype(jnp.bfloat16)
        self.fc1_b = b                                  # (1, 512) f32

    def task_configure(self, task_id, s_shape, a_shape):
        if task_id not in self.task_ids:
            self._key, k = jax.random.split(self._key)
            if len(s_shape) == 3:
                ks = jax.random.split(k, 4)
                c1w, c1b = _init_conv(ks[0], 1, 32, 8)        # Conv2d(1, 32, 8, 4)
                c2w, c2b = _init_conv(ks[1], 32, 64, 4)       # Conv2d(32, 64, 4, 2)
                c3w, c3b = _init_conv(ks[2], 64, 64, 3)       # Conv2d(64, 64, 3, 1)
                lw, lb = _init_linear(ks[3], 2304, HL_SIZE)   # Linear(2304, 512)
                # NOTE: lw rows are in (H, W, C) flatten order (NHWC path).  To load
                # PyTorch weights ((C, H, W) order) permute with
                # lw.reshape(64,6,6,512).transpose(1,2,0,3).reshape(2304,512).
                params = (_conv_to_matmul_layout(c1w), c1b,
                          _conv_to_matmul_layout(c2w), c2b,
                          _conv_to_matmul_layout(c3w), c3b,
                          lw.astype(jnp.bfloat16), lb)
                self.fc_ins[task_id] = ("conv", params)
            else:
                s_dim = s_shape[0]
                w, b = _init_linear(k, s_dim, HL_SIZE)
                kp = _round_up(s_dim, 128)                    # lane-pad contraction dim
                w_pad = jnp.zeros((kp, HL_SIZE), jnp.float32).at[:s_dim].set(w)
                self.fc_ins[task_id] = ("linear", (w_pad.astype(jnp.bfloat16), b))
            self._key, ko = jax.random.split(self._key)
            a_dim = a_shape[0]
            wo, bo = _init_linear(ko, HL_SIZE, a_dim)
            ap = _round_up(a_dim, 128)                        # lane-pad output dim
            wo_pad = jnp.zeros((HL_SIZE, ap), jnp.float32).at[:, :a_dim].set(wo)
            bo_pad = jnp.zeros((1, ap), jnp.float32).at[:, :a_dim].set(bo)
            self.fc_outs[task_id] = (wo_pad.astype(jnp.bfloat16), bo_pad)
            self.a_dims[task_id] = a_dim
            self.task_ids.append(task_id)
            self.task_shapes[task_id] = len(s_shape)
        self.curr_task_id = task_id

    def forward(self, observations):
        tid = self.curr_task_id
        kind, params = self.fc_ins[tid]
        w_out, b_out = self.fc_outs[tid]
        a_dim = self.a_dims[tid]
        if kind == "conv":
            return _forward_image(observations, *params, self.fc1_w, self.fc1_b,
                                  w_out, b_out, a_dim=a_dim)
        w_in, b_in = params
        return _forward_vector(observations, w_in, b_in, self.fc1_w, self.fc1_b,
                               w_out, b_out, a_dim=a_dim)


# --------------------------------------------------------------------------
if __name__ == "__main__":
    key = jax.random.PRNGKey(0)
    k_net, k_vec, k_img = jax.random.split(key, 3)

    net = ValueNetPallas(k_net)

    # Task 0: low-dimensional vector observations (e.g. classic control).
    B, S_DIM, A_DIM_VEC = 2, 32, 8
    net.task_configure(0, (S_DIM,), (A_DIM_VEC,))
    obs_vec = jax.random.normal(k_vec, (B, S_DIM), jnp.float32)
    out_vec = net.forward(obs_vec)
    jax.block_until_ready(out_vec)
    assert out_vec.shape == (B, A_DIM_VEC) and out_vec.dtype == jnp.float32

    # Task 1: image observations (NCHW, 80x80 -> 2304 flat features, as implied
    # by the module's hard-coded Linear(2304, 512)).
    A_DIM_IMG = 6
    net.task_configure(1, (1, 80, 80), (A_DIM_IMG,))
    obs_img = jax.random.normal(k_img, (B, 1, 80, 80), jnp.float32)
    out_img = net.forward(obs_img)
    jax.block_until_ready(out_img)
    assert out_img.shape == (B, A_DIM_IMG) and out_img.dtype == jnp.float32

    print("KERNEL_OK")
</pallas_src>

<mosaic_0001>
module attributes {stable_mosaic.version = 11 : i64} {
  func.func @_mlp_head_kernel(%arg0: i32, %arg1: memref<8x128xbf16, #tpu.memory_space<vmem>>, %arg2: memref<128x512xbf16, #tpu.memory_space<vmem>>, %arg3: memref<1x512xf32, #tpu.memory_space<vmem>>, %arg4: memref<512x512xbf16, #tpu.memory_space<vmem>>, %arg5: memref<1x512xf32, #tpu.memory_space<vmem>>, %arg6: memref<512x128xbf16, #tpu.memory_space<vmem>>, %arg7: memref<1x128xf32, #tpu.memory_space<vmem>>, %arg8: memref<8x128xf32, #tpu.memory_space<vmem>>) attributes {dimension_semantics = [#tpu.dimension_semantics<arbitrary>], iteration_bounds = array<i64: 1>, scalar_prefetch = 0 : i64, scratch_operands = 0 : i64, tpu.core_type = #tpu.core_type<tc>, window_params = [{pipeline_mode = #tpu.pipeline_mode<synchronous>, transform_indices = @transform_0, window_bounds = array<i64: 8, 128>}, {pipeline_mode = #tpu.pipeline_mode<synchronous>, transform_indices = @transform_1, window_bounds = array<i64: 128, 512>}, {pipeline_mode = #tpu.pipeline_mode<synchronous>, transform_indices = @transform_2, window_bounds = array<i64: 1, 512>}, {pipeline_mode = #tpu.pipeline_mode<synchronous>, transform_indices = @transform_3, window_bounds = array<i64: 512, 512>}, {pipeline_mode = #tpu.pipeline_mode<synchronous>, transform_indices = @transform_4, window_bounds = array<i64: 1, 512>}, {pipeline_mode = #tpu.pipeline_mode<synchronous>, transform_indices = @transform_5, window_bounds = array<i64: 512, 128>}, {pipeline_mode = #tpu.pipeline_mode<synchronous>, transform_indices = @transform_6, window_bounds = array<i64: 1, 128>}, {pipeline_mode = #tpu.pipeline_mode<synchronous>, transform_indices = @transform_7, window_bounds = array<i64: 8, 128>}]} {
    %c0 = arith.constant 0 : index
    %c0_0 = arith.constant 0 : index
    %0 = vector.load %arg1[%c0, %c0_0] : memref<8x128xbf16, #tpu.memory_space<vmem>>, vector<8x128xbf16>
    %c0_1 = arith.constant 0 : index
    %c0_2 = arith.constant 0 : index
    %1 = vector.load %arg2[%c0_1, %c0_2] : memref<128x512xbf16, #tpu.memory_space<vmem>>, vector<128x512xbf16>
    %cst = arith.constant dense<0.000000e+00> : vector<8x512xf32>
    %2 = tpu.matmul %0, %1, %cst {dimension_numbers = #tpu.dot_dimension_numbers<[1], [0], [0], [1], [0, 0, 1, 1], [], []>} : vector<8x128xbf16>, vector<128x512xbf16>, vector<8x512xf32> -> vector<8x512xf32>
    %c0_3 = arith.constant 0 : index
    %c0_4 = arith.constant 0 : index
    %3 = vector.load %arg3[%c0_3, %c0_4] : memref<1x512xf32, #tpu.memory_space<vmem>>, vector<1x512xf32>
    %4 = vector.broadcast %3 : vector<1x512xf32> to vector<8x512xf32>
    %5 = arith.addf %2, %4 : vector<8x512xf32>
    %cst_5 = arith.constant 0.000000e+00 : f32
    %6 = vector.broadcast %cst_5 : f32 to vector<8x512xf32>
    %7 = arith.maximumf %5, %6 : vector<8x512xf32>
    %8 = arith.truncf %7 : vector<8x512xf32> to vector<8x512xbf16>
    %c0_6 = arith.constant 0 : index
    %c0_7 = arith.constant 0 : index
    %9 = vector.load %arg4[%c0_6, %c0_7] : memref<512x512xbf16, #tpu.memory_space<vmem>>, vector<512x512xbf16>
    %cst_8 = arith.constant dense<0.000000e+00> : vector<8x512xf32>
    %10 = tpu.matmul %8, %9, %cst_8 {dimension_numbers = #tpu.dot_dimension_numbers<[1], [0], [0], [1], [0, 0, 1, 1], [], []>} : vector<8x512xbf16>, vector<512x512xbf16>, vector<8x512xf32> -> vector<8x512xf32>
    %c0_9 = arith.constant 0 : index
    %c0_10 = arith.constant 0 : index
    %11 = vector.load %arg5[%c0_9, %c0_10] : memref<1x512xf32, #tpu.memory_space<vmem>>, vector<1x512xf32>
    %12 = vector.broadcast %11 : vector<1x512xf32> to vector<8x512xf32>
    %13 = arith.addf %10, %12 : vector<8x512xf32>
    %cst_11 = arith.constant 0.000000e+00 : f32
    %14 = vector.broadcast %cst_11 : f32 to vector<8x512xf32>
    %15 = arith.maximumf %13, %14 : vector<8x512xf32>
    %16 = arith.truncf %15 : vector<8x512xf32> to vector<8x512xbf16>
    %c0_12 = arith.constant 0 : index
    %c0_13 = arith.constant 0 : index
    %17 = vector.load %arg6[%c0_12, %c0_13] : memref<512x128xbf16, #tpu.memory_space<vmem>>, vector<512x128xbf16>
    %cst_14 = arith.constant dense<0.000000e+00> : vector<8x128xf32>
    %18 = tpu.matmul %16, %17, %cst_14 {dimension_numbers = #tpu.dot_dimension_numbers<[1], [0], [0], [1], [0, 0, 1, 1], [], []>} : vector<8x512xbf16>, vector<512x128xbf16>, vector<8x128xf32> -> vector<8x128xf32>
    %c0_15 = arith.constant 0 : index
    %c0_16 = arith.constant 0 : index
    %19 = vector.load %arg7[%c0_15, %c0_16] : memref<1x128xf32, #tpu.memory_space<vmem>>, vector<1x128xf32>
    %20 = vector.broadcast %19 : vector<1x128xf32> to vector<8x128xf32>
    %21 = arith.addf %18, %20 : vector<8x128xf32>
    %c0_17 = arith.constant 0 : index
    %c0_18 = arith.constant 0 : index
    %22 = vector.load %arg8[%c0_17, %c0_18] : memref<8x128xf32, #tpu.memory_space<vmem>>, vector<8x128xf32>
    tpu.vector_store %arg8[%c0_17, %c0_18], %21 {strides = array<i32>} : memref<8x128xf32, #tpu.memory_space<vmem>>, vector<8x128xf32>,
    return
  }
  func.func @transform_0(%arg0: i32) -> (i32, i32) {
    %c0_i32 = arith.constant 0 : i32
    %c0_i32_0 = arith.constant 0 : i32
    %c0_i32_1 = arith.constant 0 : i32
    return %c0_i32, %c0_i32_0 : i32, i32
  }
  func.func @transform_1(%arg0: i32) -> (i32, i32) {
    %c0_i32 = arith.constant 0 : i32
    %c0_i32_0 = arith.constant 0 : i32
    %c0_i32_1 = arith.constant 0 : i32
    return %c0_i32, %c0_i32_0 : i32, i32
  }
  func.func @transform_2(%arg0: i32) -> (i32, i32) {
    %c0_i32 = arith.constant 0 : i32
    %c0_i32_0 = arith.constant 0 : i32
    %c0_i32_1 = arith.constant 0 : i32
    return %c0_i32, %c0_i32_0 : i32, i32
  }
  func.func @transform_3(%arg0: i32) -> (i32, i32) {
    %c0_i32 = arith.constant 0 : i32
    %c0_i32_0 = arith.constant 0 : i32
    %c0_i32_1 = arith.constant 0 : i32
    return %c0_i32, %c0_i32_0 : i32, i32
  }
  func.func @transform_4(%arg0: i32) -> (i32, i32) {
    %c0_i32 = arith.constant 0 : i32
    %c0_i32_0 = arith.constant 0 : i32
    %c0_i32_1 = arith.constant 0 : i32
    return %c0_i32, %c0_i32_0 : i32, i32
  }
  func.func @transform_5(%arg0: i32) -> (i32, i32) {
    %c0_i32 = arith.constant 0 : i32
    %c0_i32_0 = arith.constant 0 : i32
    %c0_i32_1 = arith.constant 0 : i32
    return %c0_i32, %c0_i32_0 : i32, i32
  }
  func.func @transform_6(%arg0: i32) -> (i32, i32) {
    %c0_i32 = arith.constant 0 : i32
    %c0_i32_0 = arith.constant 0 : i32
    %c0_i32_1 = arith.constant 0 : i32
    return %c0_i32, %c0_i32_0 : i32, i32
  }
  func.func @transform_7(%arg0: i32) -> (i32, i32) {
    %c0_i32 = arith.constant 0 : i32
    %c0_i32_0 = arith.constant 0 : i32
    %c0_i32_1 = arith.constant 0 : i32
    return %c0_i32, %c0_i32_0 : i32, i32
  }
}

</mosaic_0001>

<bundles_post_ra>
// kernel: _forward_vector.1
= control target key start
LH: loop header
LB: loop body
LE: loop exit
PB: predicated region body
PF: predicated region fallthrough
CT: control target
= control target key end

     0   :  { %12 = vsyncpa [#allocation3], 0  ;;  %s2368_s0 = inlined_call_operand.vmem [shape: bf16[8,128], index: 0, kind: input, shape index: {}]   ;;  %s2369_s1 = inlined_call_operand.hbm [shape: bf16[128,512], index: 1, kind: input, shape index: {}]   ;;  %s2370_s2 = inlined_call_operand.vmem [shape: f32[1,512], index: 2, kind: input, shape index: {}]   ;;  %s2371_s3 = inlined_call_operand.hbm [shape: bf16[512,512], index: 3, kind: input, shape index: {}]   ;;  %s2372_s4 = inlined_call_operand.vmem [shape: f32[1,512], index: 4, kind: input, shape index: {}]   ;;  %s2373_s5 = inlined_call_operand.hbm [shape: bf16[512,128], index: 5, kind: input, shape index: {}]   ;;  %s2374_s6 = inlined_call_operand.vmem [shape: f32[1,128], index: 6, kind: input, shape index: {}]   ;;  %s2375_s7 = inlined_call_operand.vmem [shape: f32[8,128], index: 7, kind: output, shape index: {}]  }
   0x1   :  { %13 = vsyncpa [#allocation5], 0  ;;  %s2266_s24 = smov [#allocation4]   ;;  %s2267_s26 = smov [#allocation2]  }
   0x2   :  { %s35_s25 = sshll.u32 %s2266_s24, 4  ;;  %s21_s27 = sshll.u32 %s2267_s26, 4  ;;  %s36_s25 = int_to_ptr.vmem [resolvable:$true] %s35_s25  ;;  %s22_s27 = int_to_ptr.vmem [resolvable:$true] %s21_s27 }
   0x3   :  { %s2210_s28 = scalar_lea.vmem %s36_s25, 16384  ;;  %p2215_p1 = scmp.lt.s32.totalorder %s36_s25, %s36_s25 }
   0x4   :  { %p2211_p0 = scmp.ne.s32.totalorder %s36_s25, %s2210_s28  ;;  %p2216_p2 = scmp.lt.s32.totalorder %s2210_s28, %s2210_s28 }
   0x6   :  { %p2217_p3 = por %p2216_p2, %p2215_p1 }
   0x8   :  { %p2218_p4 = pnand %p2217_p3, %p2211_p0 }
   0xa   :  { %2221 = shalt.err (!%p2218_p4)
}
   0xb   :  { %s2268_s29 = smov 256   ;;  %s2269_s30 = smov 16  }
   0xc   :  { %41 = dma.hbm_to_vmem [thread:$0]  %s2371_s3, 16384, %s36_s25, [#allocation5], %s2268_s29, %s2268_s29, %s2269_s30  }
   0xd   :  { %s2230_s10 = scalar_lea.vmem %s22_s27, 4096  ;;  %p2235_p6 = scmp.lt.s32.totalorder %s22_s27, %s22_s27 }
   0xe   :  { %p2231_p5 = scmp.ne.s32.totalorder %s22_s27, %s2230_s10  ;;  %p2236_p7 = scmp.lt.s32.totalorder %s2230_s10, %s2230_s10 }
  0x10   :  { %p2237_p8 = por %p2236_p7, %p2235_p6 }
  0x12   :  { %p2238_p9 = pnand %p2237_p8, %p2231_p5 }
  0x14   :  { %2241 = shalt.err (!%p2238_p9)
}
  0x15   :  { %27 = dma.hbm_to_vmem [thread:$0]  %s2369_s1, 4096, %s22_s27, [#allocation3], %s2268_s29, %s2268_s29, %s2269_s30  }
  0x16   :  { %s2270_s13 = smov [#allocation6]  }
  0x17   :  { %s49_s14 = sshll.u32 %s2270_s13, 4  ;;  %s50_s14 = int_to_ptr.vmem [resolvable:$true] %s49_s14 }
  0x18   :  { %s2250_s15 = scalar_lea.vmem %s50_s14, 4096  ;;  %p2255_p11 = scmp.lt.s32.totalorder %s50_s14, %s50_s14 }
  0x19   :  { %p2251_p10 = scmp.ne.s32.totalorder %s50_s14, %s2250_s15  ;;  %p2256_p12 = scmp.lt.s32.totalorder %s2250_s15, %s2250_s15 }
  0x1b   :  { %p2257_p13 = por %p2256_p12, %p2255_p11 }
  0x1d   :  { %p2258_p0 = pnand %p2257_p13, %p2251_p10 }
  0x1f   :  { %2261 = shalt.err (!%p2258_p0)
}
  0x20   :  { %s2271_s3 = smov 64   ;;  %s2272_s16 = smov 4  }
  0x21   :  { %55 = dma.hbm_to_vmem [thread:$0]  %s2373_s5, 4096, %s50_s14, [#allocation5], %s2271_s3, %s2271_s3, %s2272_s16  }
  0x22   :  { %2262 = dma.done.wait [#allocation3], 4096  }
  0x23   :  { %2263 = vsyncadd [#allocation3], 4294963200 }
  0x24   :  { %2264 = dma.done.wait [#allocation5], 20480  }
  0x25   :  { %2265 = vsyncadd [#allocation5], 4294946816  ;;  %v2273_v0 = vmov 0   ;;  %v1930_v1 = vld [vmem:[#allocation2 + $0xe4] ss:$16 sps:$4 sm:$0xff]  }
  0x26   :  { %315 = vmatprep.mubr.bf16.mxu0 %v2273_v0  ;;  %356 = vmatprep.mubr.bf16.mxu1 %v2273_v0  ;;  %v1932_v2 = vld [vmem:[#allocation2 + $0xec] ss:$16 sps:$4 sm:$0xff]   ;;  %v1934_v3 = vld [vmem:[#allocation2 + $0xe0] ss:$16 sps:$4 sm:$0xff]   ;;  %v1935_v4 = vld [vmem:[#allocation2 + $0xe8] ss:$16 sps:$4 sm:$0xff]  }
  0x27   :  { %283 = vmatprep.subr.bf16.mxu0 %v1930_v1  ;;  %324 = vmatprep.subr.bf16.mxu1 %v1932_v2  ;;  %v1936_v5 = vld [vmem:[#allocation2 + $0xc4] ss:$16 sps:$4 sm:$0xff]   ;;  %v1938_v6 = vld [vmem:[#allocation2 + $0xcc] ss:$16 sps:$4 sm:$0xff]   ;;  %v1940_v7 = vld [vmem:[#allocation2 + $0xc0] ss:$16 sps:$4 sm:$0xff]  }
  0x28   :  { %284 = vmatpush1.bf16.msra.mxu0 %v1934_v3  ;;  %325 = vmatpush1.bf16.msra.mxu1 %v1935_v4  ;;  %v1941_v8 = vld [vmem:[#allocation2 + $0xc8] ss:$16 sps:$4 sm:$0xff]   ;;  %v1942_v9 = vld [vmem:[#allocation2 + $0xa4] ss:$16 sps:$4 sm:$0xff]   ;;  %v1944_v10 = vld [vmem:[#allocation2 + $0xac] ss:$16 sps:$4 sm:$0xff]  }
  0x29   :  { %285 = vmatprep.subr.bf16.mxu0 %v1936_v5  ;;  %326 = vmatprep.subr.bf16.mxu1 %v1938_v6  ;;  %v1946_v11 = vld [vmem:[#allocation2 + $0xa0] ss:$16 sps:$4 sm:$0xff]   ;;  %v1947_v12 = vld [vmem:[#allocation2 + $0xa8] ss:$16 sps:$4 sm:$0xff]   ;;  %v1948_v13 = vld [vmem:[#allocation2 + $0x84] ss:$16 sps:$4 sm:$0xff]  }
  0x2a   :  { %v1950_v14 = vld [vmem:[#allocation2 + $0x8c] ss:$16 sps:$4 sm:$0xff]   ;;  %v1952_v15 = vld [vmem:[#allocation2 + $0x80] ss:$16 sps:$4 sm:$0xff]   ;;  %v1953_v16 = vld [vmem:[#allocation2 + $0x88] ss:$16 sps:$4 sm:$0xff]  }
  0x2b   :  { %v1954_v17 = vld [vmem:[#allocation2 + $0x64] ss:$16 sps:$4 sm:$0xff]   ;;  %v1956_v18 = vld [vmem:[#allocation2 + $0x6c] ss:$16 sps:$4 sm:$0xff]   ;;  %v1958_v19 = vld [vmem:[#allocation2 + $0x60] ss:$16 sps:$4 sm:$0xff]  }
  0x2c   :  { %286 = vmatpush1.bf16.msra.mxu0 %v1940_v7  ;;  %327 = vmatpush1.bf16.msra.mxu1 %v1941_v8  ;;  %v1959_v20 = vld [vmem:[#allocation2 + $0x68] ss:$16 sps:$4 sm:$0xff]   ;;  %v1960_v21 = vld [vmem:[#allocation2 + $0x44] ss:$16 sps:$4 sm:$0xff]   ;;  %v1962_v22 = vld [vmem:[#allocation2 + $0x4c] ss:$16 sps:$4 sm:$0xff]  }
  0x2d   :  { %287 = vmatprep.subr.bf16.mxu0 %v1942_v9  ;;  %328 = vmatprep.subr.bf16.mxu1 %v1944_v10  ;;  %v1964_v23 = vld [vmem:[#allocation2 + $0x40] ss:$16 sps:$4 sm:$0xff]   ;;  %v1965_v24 = vld [vmem:[#allocation2 + $0x48] ss:$16 sps:$4 sm:$0xff]   ;;  %v1966_v25 = vld [vmem:[#allocation2 + $0x24] ss:$16 sps:$4 sm:$0xff]  }
  0x2e   :  { %v1968_v26 = vld [vmem:[#allocation2 + $0x2c] ss:$16 sps:$4 sm:$0xff]   ;;  %v1970_v27 = vld [vmem:[#allocation2 + $0x20] ss:$16 sps:$4 sm:$0xff]   ;;  %v1971_v28 = vld [vmem:[#allocation2 + $0x28] ss:$16 sps:$4 sm:$0xff]  }
  0x2f   :  { %v1972_v29 = vld [vmem:[#allocation2 + $0x4] ss:$16 sps:$4 sm:$0xff]   ;;  %v1974_v30 = vld [vmem:[#allocation2 + $0xc] ss:$16 sps:$4 sm:$0xff]   ;;  %v1976_v31 = vld [vmem:[#allocation2] ss:$16 sps:$4 sm:$0xff]  }
  0x30   :  { %288 = vmatpush1.bf16.msra.mxu0 %v1946_v11  ;;  %329 = vmatpush1.bf16.msra.mxu1 %v1947_v12  ;;  %v1977_v32 = vld [vmem:[#allocation2 + $0x8] ss:$16 sps:$4 sm:$0xff]   ;;  %v1980_v33 = vld [vmem:[#allocation4 + $0xe4] ss:$16 sps:$4 sm:$0xff]   ;;  %v68_v35 = vld [vmem:[%s2368_s0] sm:$0xf] }
  0x31   :  { %289 = vmatprep.subr.bf16.mxu0 %v1948_v13  ;;  %330 = vmatprep.subr.bf16.mxu1 %v1950_v14  ;;  %v1983_v34 = vld [vmem:[#allocation4 + $0x2e4] ss:$16 sps:$4 sm:$0xff]   ;;  %v1978_v36 = vld [vmem:[#allocation4 + $0xe0] ss:$16 sps:$4 sm:$0xff]  }
  0x32   :  { %v1981_v37 = vld [vmem:[#allocation4 + $0x2e0] ss:$16 sps:$4 sm:$0xff]   ;;  %v1986_v38 = vld [vmem:[#allocation4 + $0xc4] ss:$16 sps:$4 sm:$0xff]  }
  0x33   :  { %v1989_v39 = vld [vmem:[#allocation4 + $0x2c4] ss:$16 sps:$4 sm:$0xff]   ;;  %v1984_v40 = vld [vmem:[#allocation4 + $0xc0] ss:$16 sps:$4 sm:$0xff]  }
  0x34   :  { %290 = vmatpush1.bf16.msra.mxu0 %v1952_v15  ;;  %331 = vmatpush1.bf16.msra.mxu1 %v1953_v16  ;;  %v1987_v41 = vld [vmem:[#allocation4 + $0x2c0] ss:$16 sps:$4 sm:$0xff]   ;;  %v1992_v42 = vld [vmem:[#allocation4 + $0xa4] ss:$16 sps:$4 sm:$0xff]  }
  0x35   :  { %291 = vmatprep.subr.bf16.mxu0 %v1954_v17  ;;  %332 = vmatprep.subr.bf16.mxu1 %v1956_v18  ;;  %v1995_v43 = vld [vmem:[#allocation4 + $0x2a4] ss:$16 sps:$4 sm:$0xff]   ;;  %v1990_v44 = vld [vmem:[#allocation4 + $0xa0] ss:$16 sps:$4 sm:$0xff]  }
  0x36   :  { %v1993_v45 = vld [vmem:[#allocation4 + $0x2a0] ss:$16 sps:$4 sm:$0xff]   ;;  %v1998_v46 = vld [vmem:[#allocation4 + $0x84] ss:$16 sps:$4 sm:$0xff]  }
  0x37   :  { %v2001_v47 = vld [vmem:[#allocation4 + $0x284] ss:$16 sps:$4 sm:$0xff]   ;;  %v1996_v48 = vld [vmem:[#allocation4 + $0x80] ss:$16 sps:$4 sm:$0xff]  }
  0x38   :  { %292 = vmatpush1.bf16.msra.mxu0 %v1958_v19  ;;  %333 = vmatpush1.bf16.msra.mxu1 %v1959_v20  ;;  %v1999_v49 = vld [vmem:[#allocation4 + $0x280] ss:$16 sps:$4 sm:$0xff]   ;;  %v2004_v50 = vld [vmem:[#allocation4 + $0x64] ss:$16 sps:$4 sm:$0xff]  }
  0x39   :  { %293 = vmatprep.subr.bf16.mxu0 %v1960_v21  ;;  %334 = vmatprep.subr.bf16.mxu1 %v1962_v22  ;;  %v2007_v51 = vld [vmem:[#allocation4 + $0x264] ss:$16 sps:$4 sm:$0xff]   ;;  %v2002_v52 = vld [vmem:[#allocation4 + $0x60] ss:$16 sps:$4 sm:$0xff]  }
  0x3a   :  { %v2005_v53 = vld [vmem:[#allocation4 + $0x260] ss:$16 sps:$4 sm:$0xff]   ;;  %v2010_v54 = vld [vmem:[#allocation4 + $0x44] ss:$16 sps:$4 sm:$0xff]  }
  0x3b   :  { %v2013_v55 = vld [vmem:[#allocation4 + $0x244] ss:$16 sps:$4 sm:$0xff]   ;;  %v2008_v56 = vld [vmem:[#allocation4 + $0x40] ss:$16 sps:$4 sm:$0xff]  }
  0x3c   :  { %294 = vmatpush1.bf16.msra.mxu0 %v1964_v23  ;;  %335 = vmatpush1.bf16.msra.mxu1 %v1965_v24  ;;  %v2011_v57 = vld [vmem:[#allocation4 + $0x240] ss:$16 sps:$4 sm:$0xff]   ;;  %v2016_v58 = vld [vmem:[#allocation4 + $0x24] ss:$16 sps:$4 sm:$0xff]  }
  0x3d   :  { %295 = vmatprep.subr.bf16.mxu0 %v1966_v25  ;;  %336 = vmatprep.subr.bf16.mxu1 %v1968_v26  ;;  %v2019_v59 = vld [vmem:[#allocation4 + $0x224] ss:$16 sps:$4 sm:$0xff]   ;;  %v2014_v60 = vld [vmem:[#allocation4 + $0x20] ss:$16 sps:$4 sm:$0xff]  }
  0x3e   :  { %v2017_v61 = vld [vmem:[#allocation4 + $0x220] ss:$16 sps:$4 sm:$0xff]   ;;  %v2022_v62 = vld [vmem:[#allocation4 + $0x4] ss:$16 sps:$4 sm:$0xff]  }
  0x3f   :  { %v2025_v63 = vld [vmem:[#allocation4 + $0x204] ss:$16 sps:$4 sm:$0xff]   ;;  %v2020_v0 = vld [vmem:[#allocation4] ss:$16 sps:$4 sm:$0xff]  }
  0x40   :  { %296 = vmatpush1.bf16.msra.mxu0 %v1970_v27  ;;  %337 = vmatpush1.bf16.msra.mxu1 %v1971_v28  ;;  %v2023_v1 = vld [vmem:[#allocation4 + $0x200] ss:$16 sps:$4 sm:$0xff]   ;;  %v2028_v2 = vld [vmem:[#allocation4 + $0x1e4] ss:$16 sps:$4 sm:$0xff]  }
  0x41   :  { %297 = vmatprep.subr.bf16.mxu0 %v1972_v29  ;;  %338 = vmatprep.subr.bf16.mxu1 %v1974_v30  ;;  %v2031_v3 = vld [vmem:[#allocation4 + $0x3e4] ss:$16 sps:$4 sm:$0xff]   ;;  %v2026_v4 = vld [vmem:[#allocation4 + $0x1e0] ss:$16 sps:$4 sm:$0xff]  }
  0x42   :  { %v2029_v5 = vld [vmem:[#allocation4 + $0x3e0] ss:$16 sps:$4 sm:$0xff]   ;;  %v2034_v6 = vld [vmem:[#allocation4 + $0x1c4] ss:$16 sps:$4 sm:$0xff]  }
  0x43   :  { %v2037_v7 = vld [vmem:[#allocation4 + $0x3c4] ss:$16 sps:$4 sm:$0xff]   ;;  %v2032_v8 = vld [vmem:[#allocation4 + $0x1c0] ss:$16 sps:$4 sm:$0xff]  }
  0x44   :  { %298 = vmatpush1.bf16.msra.mxu0 %v1976_v31  ;;  %339 = vmatpush1.bf16.msra.mxu1 %v1977_v32  ;;  %v2035_v9 = vld [vmem:[#allocation4 + $0x3c0] ss:$16 sps:$4 sm:$0xff]   ;;  %v2040_v10 = vld [vmem:[#allocation4 + $0x1a4] ss:$16 sps:$4 sm:$0xff]  }
  0x45   :  { %1163 = vmatprep.subr.bf16.mxu0 %v1980_v33  ;;  %1204 = vmatprep.subr.bf16.mxu1 %v1983_v34  ;;  %v2043_v11 = vld [vmem:[#allocation4 + $0x3a4] ss:$16 sps:$4 sm:$0xff]   ;;  %v2038_v12 = vld [vmem:[#allocation4 + $0x1a0] ss:$16 sps:$4 sm:$0xff]   ;;  %v2076_v34 = vld [vmem:[#allocation4 + $0xec] ss:$16 sps:$4 sm:$0xff]  }
  0x46   :  { %v2041_v13 = vld [vmem:[#allocation4 + $0x3a0] ss:$16 sps:$4 sm:$0xff]   ;;  %v2046_v14 = vld [vmem:[#allocation4 + $0x184] ss:$16 sps:$4 sm:$0xff]  }
  0x47   :  { %316 = vmatmul.mubr.bf16.vlgmr.msra.gmra.mxu0 %v68_v35  ;;  %357 = vmatmul.mubr.bf16.vlgmr.msra.gmra.mxu1 %v68_v35  ;;  %v2049_v15 = vld [vmem:[#allocation4 + $0x384] ss:$16 sps:$4 sm:$0xff]   ;;  %v2044_v16 = vld [vmem:[#allocation4 + $0x180] ss:$16 sps:$4 sm:$0xff]   ;;  %v2079_v35 = vld [vmem:[#allocation4 + $0x2ec] ss:$16 sps:$4 sm:$0xff]  }
  0x48   :  { %1164 = vmatpush1.bf16.msra.mxu0 %v1978_v36  ;;  %1205 = vmatpush1.bf16.msra.mxu1 %v1981_v37  ;;  %v2047_v17 = vld [vmem:[#allocation4 + $0x380] ss:$16 sps:$4 sm:$0xff]   ;;  %v2052_v18 = vld [vmem:[#allocation4 + $0x164] ss:$16 sps:$4 sm:$0xff]   ;;  %v103_v36 = vlaneseq }
  0x49   :  { %1165 = vmatprep.subr.bf16.mxu0 %v1986_v38  ;;  %1206 = vmatprep.subr.bf16.mxu1 %v1989_v39  ;;  %v2055_v19 = vld [vmem:[#allocation4 + $0x364] ss:$16 sps:$4 sm:$0xff]   ;;  %v2050_v20 = vld [vmem:[#allocation4 + $0x160] ss:$16 sps:$4 sm:$0xff]  }
  0x4a   :  { %v2053_v21 = vld [vmem:[#allocation4 + $0x360] ss:$16 sps:$4 sm:$0xff]   ;;  %v2058_v22 = vld [vmem:[#allocation4 + $0x144] ss:$16 sps:$4 sm:$0xff]   ;;  %v2326_v37 = vshrl.u32 %v103_v36, 7 }
  0x4b   :  { %v2061_v23 = vld [vmem:[#allocation4 + $0x344] ss:$16 sps:$4 sm:$0xff]   ;;  %v2056_v24 = vld [vmem:[#allocation4 + $0x140] ss:$16 sps:$4 sm:$0xff]   ;;  %v2125_v36 = vld [vmem:[#allocation4 + $0x3e8] ss:$16 sps:$4 sm:$0xff]  }
  0x4c   :  { %1166 = vmatpush1.bf16.msra.mxu0 %v1984_v40  ;;  %1207 = vmatpush1.bf16.msra.mxu1 %v1987_v41  ;;  %v2059_v25 = vld [vmem:[#allocation4 + $0x340] ss:$16 sps:$4 sm:$0xff]   ;;  %v2064_v26 = vld [vmem:[#allocation4 + $0x124] ss:$16 sps:$4 sm:$0xff]   ;;  %v105_v38 = vsub.s32 0, %v2326_v37  ;;  %v113_v39 = vsub.s32 2, %v2326_v37 }
  0x4d   :  { %1167 = vmatprep.subr.bf16.mxu0 %v1992_v42  ;;  %1208 = vmatprep.subr.bf16.mxu1 %v1995_v43  ;;  %v2067_v27 = vld [vmem:[#allocation4 + $0x324] ss:$16 sps:$4 sm:$0xff]   ;;  %v2062_v28 = vld [vmem:[#allocation4 + $0x120] ss:$16 sps:$4 sm:$0xff]   ;;  %v109_v41 = vsub.s32 1, %v2326_v37  ;;  %v117_v42 = vsub.s32 3, %v2326_v37 }
  0x4e   :  { %v2065_v29 = vld [vmem:[#allocation4 + $0x320] ss:$16 sps:$4 sm:$0xff]   ;;  %v2070_v30 = vld [vmem:[#allocation4 + $0x104] ss:$16 sps:$4 sm:$0xff]  }
  0x4f   :  { %v2073_v31 = vld [vmem:[#allocation4 + $0x304] ss:$16 sps:$4 sm:$0xff]   ;;  %v2068_v32 = vld [vmem:[#allocation4 + $0x100] ss:$16 sps:$4 sm:$0xff]  }
  0x50   :  { %1168 = vmatpush1.bf16.msra.mxu0 %v1990_v44  ;;  %1209 = vmatpush1.bf16.msra.mxu1 %v1993_v45  ;;  %v2071_v33 = vld [vmem:[#allocation4 + $0x300] ss:$16 sps:$4 sm:$0xff]  }
  0x51   :  { %1169 = vmatprep.subr.bf16.mxu0 %v1998_v46  ;;  %1210 = vmatprep.subr.bf16.mxu1 %v2001_v47  ;;  %v101_v40 = vld [vmem:[%s2370_s2] sm:$0xf] }
  0x52   :  { %v106_v43 = vrot.slane %v101_v40, %v105_v38  ;;  %v114_v44 = vrot.slane %v101_v40, %v113_v39  ;;  %v110_v45 = vrot.slane %v101_v40, %v109_v41  ;;  %v118_v46 = vrot.slane %v101_v40, %v117_v42  ;;  %v2130_v40 = vld [vmem:[#allocation4 + $0x1cc] ss:$16 sps:$4 sm:$0xff]  }
  0x54   :  { %1170 = vmatpush1.bf16.msra.mxu0 %v1996_v48  ;;  %1211 = vmatpush1.bf16.msra.mxu1 %v1999_v49 }
  0x55   :  { %1171 = vmatprep.subr.bf16.mxu0 %v2004_v50  ;;  %1212 = vmatprep.subr.bf16.mxu1 %v2007_v51 }
  0x58   :  { %1172 = vmatpush1.bf16.msra.mxu0 %v2002_v52  ;;  %1213 = vmatpush1.bf16.msra.mxu1 %v2005_v53 }
  0x59   :  { %1173 = vmatprep.subr.bf16.mxu0 %v2010_v54  ;;  %1214 = vmatprep.subr.bf16.mxu1 %v2013_v55 }
  0x5c   :  { %1174 = vmatpush1.bf16.msra.mxu0 %v2008_v56  ;;  %1215 = vmatpush1.bf16.msra.mxu1 %v2011_v57 }
  0x5d   :  { %1175 = vmatprep.subr.bf16.mxu0 %v2016_v58  ;;  %1216 = vmatprep.subr.bf16.mxu1 %v2019_v59 }
  0x60   :  { %1176 = vmatpush1.bf16.msra.mxu0 %v2014_v60  ;;  %1217 = vmatpush1.bf16.msra.mxu1 %v2017_v61 }
  0x61   :  { %1177 = vmatprep.subr.bf16.mxu0 %v2022_v62  ;;  %1218 = vmatprep.subr.bf16.mxu1 %v2025_v63 }
  0x64   :  { %1178 = vmatpush1.bf16.msra.mxu0 %v2020_v0  ;;  %1219 = vmatpush1.bf16.msra.mxu1 %v2023_v1 }
  0x65   :  { %1179 = vmatprep.subr.bf16.mxu0 %v2028_v2  ;;  %1220 = vmatprep.subr.bf16.mxu1 %v2031_v3  ;;  %v2074_v2 = vld [vmem:[#allocation4 + $0xe8] ss:$16 sps:$4 sm:$0xff]  }
  0x66   :  { %v2077_v3 = vld [vmem:[#allocation4 + $0x2e8] ss:$16 sps:$4 sm:$0xff]  }
  0x68   :  { %1180 = vmatpush2.bf16.msra.mxu0 %v2026_v4  ;;  %1221 = vmatpush2.bf16.msra.mxu1 %v2029_v5  ;;  %v2082_v5 = vld [vmem:[#allocation4 + $0xcc] ss:$16 sps:$4 sm:$0xff]  }
  0x69   :  { %1181 = vmatprep.subr.bf16.mxu0 %v2034_v6  ;;  %1222 = vmatprep.subr.bf16.mxu1 %v2037_v7  ;;  %v2085_v6 = vld [vmem:[#allocation4 + $0x2cc] ss:$16 sps:$4 sm:$0xff]   ;;  %v2080_v7 = vld [vmem:[#allocation4 + $0xc8] ss:$16 sps:$4 sm:$0xff]  }
  0x6c   :  { %1182 = vmatpush2.bf16.msra.mxu0 %v2032_v8  ;;  %1223 = vmatpush2.bf16.msra.mxu1 %v2035_v9  ;;  %v2083_v8 = vld [vmem:[#allocation4 + $0x2c8] ss:$16 sps:$4 sm:$0xff]   ;;  %v2088_v9 = vld [vmem:[#allocation4 + $0xac] ss:$16 sps:$4 sm:$0xff]  }
  0x6d   :  { %1183 = vmatprep.subr.bf16.mxu0 %v2040_v10  ;;  %1224 = vmatprep.subr.bf16.mxu1 %v2043_v11  ;;  %v2091_v10 = vld [vmem:[#allocation4 + $0x2ac] ss:$16 sps:$4 sm:$0xff]   ;;  %v2086_v11 = vld [vmem:[#allocation4 + $0xa8] ss:$16 sps:$4 sm:$0xff]  }
  0x70   :  { %1184 = vmatpush2.bf16.msra.mxu0 %v2038_v12  ;;  %1225 = vmatpush2.bf16.msra.mxu1 %v2041_v13  ;;  %v2089_v12 = vld [vmem:[#allocation4 + $0x2a8] ss:$16 sps:$4 sm:$0xff]   ;;  %v2094_v13 = vld [vmem:[#allocation4 + $0x8c] ss:$16 sps:$4 sm:$0xff]  }
  0x71   :  { %1185 = vmatprep.subr.bf16.mxu0 %v2046_v14  ;;  %1226 = vmatprep.subr.bf16.mxu1 %v2049_v15  ;;  %v2097_v14 = vld [vmem:[#allocation4 + $0x28c] ss:$16 sps:$4 sm:$0xff]   ;;  %v2092_v15 = vld [vmem:[#allocation4 + $0x88] ss:$16 sps:$4 sm:$0xff]  }
  0x74   :  { %1186 = vmatpush2.bf16.msra.mxu0 %v2044_v16  ;;  %1227 = vmatpush2.bf16.msra.mxu1 %v2047_v17  ;;  %v2095_v16 = vld [vmem:[#allocation4 + $0x288] ss:$16 sps:$4 sm:$0xff]   ;;  %v2100_v17 = vld [vmem:[#allocation4 + $0x6c] ss:$16 sps:$4 sm:$0xff]  }
  0x75   :  { %1187 = vmatprep.subr.bf16.mxu0 %v2052_v18  ;;  %1228 = vmatprep.subr.bf16.mxu1 %v2055_v19  ;;  %v2103_v18 = vld [vmem:[#allocation4 + $0x26c] ss:$16 sps:$4 sm:$0xff]   ;;  %v2098_v19 = vld [vmem:[#allocation4 + $0x68] ss:$16 sps:$4 sm:$0xff]  }
  0x78   :  { %1188 = vmatpush2.bf16.msra.mxu0 %v2050_v20  ;;  %1229 = vmatpush2.bf16.msra.mxu1 %v2053_v21  ;;  %v2101_v20 = vld [vmem:[#allocation4 + $0x268] ss:$16 sps:$4 sm:$0xff]   ;;  %v2106_v21 = vld [vmem:[#allocation4 + $0x4c] ss:$16 sps:$4 sm:$0xff]  }
  0x79   :  { %1189 = vmatprep.subr.bf16.mxu0 %v2058_v22  ;;  %1230 = vmatprep.subr.bf16.mxu1 %v2061_v23  ;;  %v2109_v22 = vld [vmem:[#allocation4 + $0x24c] ss:$16 sps:$4 sm:$0xff]   ;;  %v2104_v23 = vld [vmem:[#allocation4 + $0x48] ss:$16 sps:$4 sm:$0xff]  }
  0x7c   :  { %1190 = vmatpush2.bf16.msra.mxu0 %v2056_v24  ;;  %1231 = vmatpush2.bf16.msra.mxu1 %v2059_v25  ;;  %v2107_v24 = vld [vmem:[#allocation4 + $0x248] ss:$16 sps:$4 sm:$0xff]   ;;  %v2112_v25 = vld [vmem:[#allocation4 + $0x2c] ss:$16 sps:$4 sm:$0xff]  }
  0x7d   :  { %1191 = vmatprep.subr.bf16.mxu0 %v2064_v26  ;;  %1232 = vmatprep.subr.bf16.mxu1 %v2067_v27  ;;  %v2115_v26 = vld [vmem:[#allocation4 + $0x22c] ss:$16 sps:$4 sm:$0xff]   ;;  %v2110_v27 = vld [vmem:[#allocation4 + $0x28] ss:$16 sps:$4 sm:$0xff]  }
  0x80   :  { %1192 = vmatpush2.bf16.msra.mxu0 %v2062_v28  ;;  %1233 = vmatpush2.bf16.msra.mxu1 %v2065_v29  ;;  %v2113_v28 = vld [vmem:[#allocation4 + $0x228] ss:$16 sps:$4 sm:$0xff]   ;;  %v2118_v29 = vld [vmem:[#allocation4 + $0xc] ss:$16 sps:$4 sm:$0xff]  }
  0x81   :  { %1193 = vmatprep.subr.bf16.mxu0 %v2070_v30  ;;  %1234 = vmatprep.subr.bf16.mxu1 %v2073_v31  ;;  %v2121_v30 = vld [vmem:[#allocation4 + $0x20c] ss:$16 sps:$4 sm:$0xff]   ;;  %v2116_v31 = vld [vmem:[#allocation4 + $0x8] ss:$16 sps:$4 sm:$0xff]  }
  0x84   :  { %1194 = vmatpush2.bf16.msra.mxu0 %v2068_v32  ;;  %1235 = vmatpush2.bf16.msra.mxu1 %v2071_v33  ;;  %v2119_v32 = vld [vmem:[#allocation4 + $0x208] ss:$16 sps:$4 sm:$0xff]   ;;  %v2124_v33 = vld [vmem:[#allocation4 + $0x1ec] ss:$16 sps:$4 sm:$0xff]  }
  0x85   :  { %1245 = vmatprep.subr.bf16.mxu0 %v2076_v34  ;;  %1286 = vmatprep.subr.bf16.mxu1 %v2079_v35  ;;  %v2127_v34 = vld [vmem:[#allocation4 + $0x3ec] ss:$16 sps:$4 sm:$0xff]   ;;  %v2122_v35 = vld [vmem:[#allocation4 + $0x1e8] ss:$16 sps:$4 sm:$0xff]  }
 0x107   :  { %v317_v47 = vpop.f32.mrf.mxu0  ;;  %v358_v48 = vpop.f32.mrf.mxu1 }
 0x108   :  { %v318_v49 = vadd.f32 %v317_v47, %v106_v43  ;;  %v359_v50 = vadd.f32 %v358_v48, %v114_v44  ;;  %v2133_v43 = vld [vmem:[#allocation4 + $0x3cc] ss:$16 sps:$4 sm:$0xff]   ;;  %v2128_v44 = vld [vmem:[#allocation4 + $0x1c8] ss:$16 sps:$4 sm:$0xff]  }
 0x109   :  { %v319_v51 = vpop.f32.mrf.mxu0  ;;  %v360_v52 = vpop.f32.mrf.mxu1  ;;  %v2139_v47 = vld [vmem:[#allocation4 + $0x3ac] ss:$16 sps:$4 sm:$0xff]   ;;  %v2134_v48 = vld [vmem:[#allocation4 + $0x1a8] ss:$16 sps:$4 sm:$0xff]  }
 0x10a   :  { %v367_v53 = vmax.f32 %v359_v50, 0.0  ;;  %v320_v54 = vadd.f32 %v319_v51, %v110_v45  ;;  %v361_v55 = vadd.f32 %v360_v52, %v118_v46  ;;  %v365_v56 = vmax.f32 %v318_v49, 0.0  ;;  %v2131_v45 = vld [vmem:[#allocation4 + $0x3c8] ss:$16 sps:$4 sm:$0xff]   ;;  %v2136_v46 = vld [vmem:[#allocation4 + $0x1ac] ss:$16 sps:$4 sm:$0xff]  }
 0x10b   :  { %v321_v57 = vpop.f32.mrf.mxu0  ;;  %v362_v58 = vpop.f32.mrf.mxu1  ;;  %v2137_v49 = vld [vmem:[#allocation4 + $0x3a8] ss:$16 sps:$4 sm:$0xff]   ;;  %v2142_v50 = vld [vmem:[#allocation4 + $0x18c] ss:$16 sps:$4 sm:$0xff]  }
 0x10c   :  { %v366_v59 = vmax.f32 %v320_v54, 0.0  ;;  %v368_v60 = vmax.f32 %v361_v55, 0.0  ;;  %v2343_v61 = vpack.c.bf16 %v367_v53, %v367_v53  ;;  %v2345_v4 = vpack.c.bf16 %v365_v56, %v365_v56  ;;  %v2145_v51 = vld [vmem:[#allocation4 + $0x38c] ss:$16 sps:$4 sm:$0xff]   ;;  %v2140_v52 = vld [vmem:[#allocation4 + $0x188] ss:$16 sps:$4 sm:$0xff]  }
 0x10d   :  { %v322_v62 = vpop.f32.mrf.mxu0  ;;  %v363_v63 = vpop.f32.mrf.mxu1  ;;  %v2143_v53 = vld [vmem:[#allocation4 + $0x388] ss:$16 sps:$4 sm:$0xff]   ;;  %v2148_v54 = vld [vmem:[#allocation4 + $0x16c] ss:$16 sps:$4 sm:$0xff]  }
 0x10e   :  { %v370_v0 = vpack.c.bf16 %v366_v59, %v366_v59  ;;  %v372_v1 = vpack.c.bf16 %v368_v60, %v368_v60  ;;  %v2151_v55 = vld [vmem:[#allocation4 + $0x36c] ss:$16 sps:$4 sm:$0xff]   ;;  %v2146_v56 = vld [vmem:[#allocation4 + $0x168] ss:$16 sps:$4 sm:$0xff]  }
 0x10f   :  { %v2149_v57 = vld [vmem:[#allocation4 + $0x368] ss:$16 sps:$4 sm:$0xff]   ;;  %v2154_v58 = vld [vmem:[#allocation4 + $0x14c] ss:$16 sps:$4 sm:$0xff]  }
 0x110   :  { %1195 = vmatprep.mubr.bf16.mxu0 %v370_v0  ;;  %1236 = vmatprep.mubr.bf16.mxu1 %v372_v1  ;;  %v2157_v59 = vld [vmem:[#allocation4 + $0x34c] ss:$16 sps:$4 sm:$0xff]   ;;  %v2152_v60 = vld [vmem:[#allocation4 + $0x148] ss:$16 sps:$4 sm:$0xff]  }
 0x111   :  { %1196 = vmatmul.mubr.bf16.vlgmr.msra.gmra.mxu0 %v2345_v4  ;;  %1237 = vmatmul.mubr.bf16.vlgmr.msra.gmra.mxu1 %v2343_v61  ;;  %v2155_v62 = vld [vmem:[#allocation4 + $0x348] ss:$16 sps:$4 sm:$0xff]   ;;  %v2160_v63 = vld [vmem:[#allocation4 + $0x12c] ss:$16 sps:$4 sm:$0xff]  }
 0x112   :  { %1246 = vmatpush1.bf16.msra.mxu0 %v2074_v2  ;;  %1287 = vmatpush1.bf16.msra.mxu1 %v2077_v3  ;;  %v2161_v2 = vld [vmem:[#allocation4 + $0x328] ss:$16 sps:$4 sm:$0xff]   ;;  %v2166_v3 = vld [vmem:[#allocation4 + $0x10c] ss:$16 sps:$4 sm:$0xff]  }
 0x113   :  { %1277 = vmatprep.mubr.bf16.mxu0 %v370_v0  ;;  %1318 = vmatprep.mubr.bf16.mxu1 %v372_v1  ;;  %v2163_v0 = vld [vmem:[#allocation4 + $0x32c] ss:$16 sps:$4 sm:$0xff]   ;;  %v2158_v1 = vld [vmem:[#allocation4 + $0x128] ss:$16 sps:$4 sm:$0xff]  }
 0x114   :  { %1247 = vmatprep.subr.bf16.mxu0 %v2082_v5  ;;  %1288 = vmatprep.subr.bf16.mxu1 %v2085_v6  ;;  %v2169_v5 = vld [vmem:[#allocation4 + $0x30c] ss:$16 sps:$4 sm:$0xff]   ;;  %v2164_v6 = vld [vmem:[#allocation4 + $0x108] ss:$16 sps:$4 sm:$0xff]  }
 0x116   :  { %1248 = vmatpush1.bf16.msra.mxu0 %v2080_v7  ;;  %1289 = vmatpush1.bf16.msra.mxu1 %v2083_v8  ;;  %v2167_v7 = vld [vmem:[#allocation4 + $0x308] ss:$16 sps:$4 sm:$0xff]  }
 0x117   :  { %1249 = vmatprep.subr.bf16.mxu0 %v2088_v9  ;;  %1290 = vmatprep.subr.bf16.mxu1 %v2091_v10  ;;  %v2170_v8 = vld [vmem:[#allocation6 + $0x78] sm:$0xff]   ;;  %v2172_v10 = vld [vmem:[#allocation6 + $0x70] sm:$0xff]  }
 0x118   :  { %v2171_v9 = vld [vmem:[#allocation6 + $0x38] sm:$0xff]  }
 0x11a   :  { %1250 = vmatpush1.bf16.msra.mxu0 %v2086_v11  ;;  %1291 = vmatpush1.bf16.msra.mxu1 %v2089_v12  ;;  %v2173_v11 = vld [vmem:[#allocation6 + $0x30] sm:$0xff]   ;;  %v2174_v12 = vld [vmem:[#allocation6 + $0x68] sm:$0xff]  }
 0x11b   :  { %1251 = vmatprep.subr.bf16.mxu0 %v2094_v13  ;;  %1292 = vmatprep.subr.bf16.mxu1 %v2097_v14  ;;  %v2175_v13 = vld [vmem:[#allocation6 + $0x28] sm:$0xff]   ;;  %v2176_v14 = vld [vmem:[#allocation6 + $0x60] sm:$0xff]  }
 0x11e   :  { %1252 = vmatpush1.bf16.msra.mxu0 %v2092_v15  ;;  %1293 = vmatpush1.bf16.msra.mxu1 %v2095_v16  ;;  %v2177_v15 = vld [vmem:[#allocation6 + $0x20] sm:$0xff]   ;;  %v2178_v16 = vld [vmem:[#allocation6 + $0x58] sm:$0xff]  }
 0x11f   :  { %1253 = vmatprep.subr.bf16.mxu0 %v2100_v17  ;;  %1294 = vmatprep.subr.bf16.mxu1 %v2103_v18  ;;  %v2186_v17 = vld [vmem:[#allocation6 + $0xf8] sm:$0xff]  }
 0x120   :  { %v2187_v18 = vld [vmem:[#allocation6 + $0xb8] sm:$0xff]  }
 0x122   :  { %1254 = vmatpush1.bf16.msra.mxu0 %v2098_v19  ;;  %1295 = vmatpush1.bf16.msra.mxu1 %v2101_v20  ;;  %v2188_v19 = vld [vmem:[#allocation6 + $0xf0] sm:$0xff]   ;;  %v2179_v20 = vld [vmem:[#allocation6 + $0x18] sm:$0xff]  }
 0x123   :  { %1255 = vmatprep.subr.bf16.mxu0 %v2106_v21  ;;  %1296 = vmatprep.subr.bf16.mxu1 %v2109_v22  ;;  %v2190_v21 = vld [vmem:[#allocation6 + $0xe8] sm:$0xff]   ;;  %v2181_v22 = vld [vmem:[#allocation6 + $0x10] sm:$0xff]  }
 0x126   :  { %1256 = vmatpush1.bf16.msra.mxu0 %v2104_v23  ;;  %1297 = vmatpush1.bf16.msra.mxu1 %v2107_v24  ;;  %v2182_v23 = vld [vmem:[#allocation6 + $0x48] sm:$0xff]  }
 0x127   :  { %1257 = vmatprep.subr.bf16.mxu0 %v2112_v25  ;;  %1298 = vmatprep.subr.bf16.mxu1 %v2115_v26  ;;  %v2191_v24 = vld [vmem:[#allocation6 + $0xa8] sm:$0xff]   ;;  %v2192_v25 = vld [vmem:[#allocation6 + $0xe0] sm:$0xff]  }
 0x128   :  { %v2183_v26 = vld [vmem:[#allocation6 + $0x8] sm:$0xff]  }
 0x12a   :  { %1258 = vmatpush1.bf16.msra.mxu0 %v2110_v27  ;;  %1299 = vmatpush1.bf16.msra.mxu1 %v2113_v28  ;;  %v2184_v27 = vld [vmem:[#allocation6 + $0x40] sm:$0xff]  }
 0x12b   :  { %1259 = vmatprep.subr.bf16.mxu0 %v2118_v29  ;;  %1300 = vmatprep.subr.bf16.mxu1 %v2121_v30  ;;  %v2193_v28 = vld [vmem:[#allocation6 + $0xa0] sm:$0xff]   ;;  %v2194_v29 = vld [vmem:[#allocation6 + $0xd8] sm:$0xff]  }
 0x12c   :  { %v2185_v30 = vld [vmem:[#allocation6] sm:$0xff]  }
 0x12e   :  { %1260 = vmatpush1.bf16.msra.mxu0 %v2116_v31  ;;  %1301 = vmatpush1.bf16.msra.mxu1 %v2119_v32  ;;  %v2195_v31 = vld [vmem:[#allocation6 + $0x98] sm:$0xff]   ;;  %v2196_v32 = vld [vmem:[#allocation6 + $0xd0] sm:$0xff]  }
 0x12f   :  { %1261 = vmatprep.subr.bf16.mxu0 %v2124_v33  ;;  %1302 = vmatprep.subr.bf16.mxu1 %v2127_v34  ;;  %v2197_v33 = vld [vmem:[#allocation6 + $0x90] sm:$0xff]   ;;  %v2198_v34 = vld [vmem:[#allocation6 + $0xc8] sm:$0xff]  }
 0x132   :  { %1262 = vmatpush2.bf16.msra.mxu0 %v2122_v35  ;;  %1303 = vmatpush2.bf16.msra.mxu1 %v2125_v36  ;;  %v2199_v35 = vld [vmem:[#allocation6 + $0x88] sm:$0xff]   ;;  %v2200_v36 = vld [vmem:[#allocation6 + $0xc0] sm:$0xff]  }
 0x133   :  { %1263 = vmatprep.subr.bf16.mxu0 %v2130_v40  ;;  %1304 = vmatprep.subr.bf16.mxu1 %v2133_v43  ;;  %v2201_v40 = vld [vmem:[#allocation6 + $0x80] sm:$0xff]  }
 0x134   :  { %v501_v43 = vld [vmem:[%s2372_s4] sm:$0xf] }
 0x136   :  { %1264 = vmatpush2.bf16.msra.mxu0 %v2128_v44  ;;  %1305 = vmatpush2.bf16.msra.mxu1 %v2131_v45  ;;  %v506_v44 = vrot.slane %v501_v43, %v105_v38  ;;  %v510_v45 = vrot.slane %v501_v43, %v109_v41  ;;  %v514_v38 = vrot.slane %v501_v43, %v113_v39 }
 0x137   :  { %1265 = vmatprep.subr.bf16.mxu0 %v2136_v46  ;;  %1306 = vmatprep.subr.bf16.mxu1 %v2139_v47  ;;  %v518_v41 = vrot.slane %v501_v43, %v117_v42 }
 0x13a   :  { %1266 = vmatpush2.bf16.msra.mxu0 %v2134_v48  ;;  %1307 = vmatpush2.bf16.msra.mxu1 %v2137_v49 }
 0x13b   :  { %1267 = vmatprep.subr.bf16.mxu0 %v2142_v50  ;;  %1308 = vmatprep.subr.bf16.mxu1 %v2145_v51 }
 0x13e   :  { %1268 = vmatpush2.bf16.msra.mxu0 %v2140_v52  ;;  %1309 = vmatpush2.bf16.msra.mxu1 %v2143_v53 }
 0x13f   :  { %1269 = vmatprep.subr.bf16.mxu0 %v2148_v54  ;;  %1310 = vmatprep.subr.bf16.mxu1 %v2151_v55 }
 0x142   :  { %1270 = vmatpush2.bf16.msra.mxu0 %v2146_v56  ;;  %1311 = vmatpush2.bf16.msra.mxu1 %v2149_v57 }
 0x143   :  { %1271 = vmatprep.subr.bf16.mxu0 %v2154_v58  ;;  %1312 = vmatprep.subr.bf16.mxu1 %v2157_v59 }
 0x146   :  { %1272 = vmatpush2.bf16.msra.mxu0 %v2152_v60  ;;  %1313 = vmatpush2.bf16.msra.mxu1 %v2155_v62 }
 0x147   :  { %1273 = vmatprep.subr.bf16.mxu0 %v2160_v63  ;;  %1314 = vmatprep.subr.bf16.mxu1 %v2163_v0 }
 0x14a   :  { %1274 = vmatpush2.bf16.msra.mxu0 %v2158_v1  ;;  %1315 = vmatpush2.bf16.msra.mxu1 %v2161_v2 }
 0x14b   :  { %1275 = vmatprep.subr.bf16.mxu0 %v2166_v3  ;;  %1316 = vmatprep.subr.bf16.mxu1 %v2169_v5 }
 0x14e   :  { %1276 = vmatpush2.bf16.msra.mxu0 %v2164_v6  ;;  %1317 = vmatpush2.bf16.msra.mxu1 %v2167_v7 }
 0x14f   :  { %1878 = vmatprep.subr.bf16.mxu0 %v2170_v8  ;;  %1900 = vmatprep.subr.bf16.mxu1 %v2186_v17 }
 0x151   :  { %1278 = vmatmul.mubr.bf16.vlgmr.msra.gmra.mxu0 %v2345_v4  ;;  %1319 = vmatmul.mubr.bf16.vlgmr.msra.gmra.mxu1 %v2343_v61  ;;  %v2180_v4 = vld [vmem:[#allocation6 + $0x50] sm:$0xff]  }
 0x152   :  { %1879 = vmatpush3.bf16.msra.mxu0 %v2171_v9  ;;  %1901 = vmatpush3.bf16.msra.mxu1 %v2187_v18  ;;  %v2189_v61 = vld [vmem:[#allocation6 + $0xb0] sm:$0xff]   ;;  %v1845_v18 = vld [vmem:[%s2374_s6] ss:$0 sm:$0xff] }
 0x153   :  { %1880 = vmatprep.subr.bf16.mxu0 %v2172_v10  ;;  %1902 = vmatprep.subr.bf16.mxu1 %v2188_v19 }
 0x156   :  { %1881 = vmatpush3.bf16.msra.mxu0 %v2173_v11  ;;  %1903 = vmatpush3.bf16.msra.mxu1 %v2189_v61 }
 0x157   :  { %1882 = vmatprep.subr.bf16.mxu0 %v2174_v12  ;;  %1904 = vmatprep.subr.bf16.mxu1 %v2190_v21 }
 0x15a   :  { %1883 = vmatpush3.bf16.msra.mxu0 %v2175_v13  ;;  %1905 = vmatpush3.bf16.msra.mxu1 %v2191_v24 }
 0x15b   :  { %1884 = vmatprep.subr.bf16.mxu0 %v2176_v14  ;;  %1906 = vmatprep.subr.bf16.mxu1 %v2192_v25 }
 0x15e   :  { %1885 = vmatpush3.bf16.msra.mxu0 %v2177_v15  ;;  %1907 = vmatpush3.bf16.msra.mxu1 %v2193_v28 }
 0x15f   :  { %1886 = vmatprep.subr.bf16.mxu0 %v2178_v16  ;;  %1908 = vmatprep.subr.bf16.mxu1 %v2194_v29 }
 0x162   :  { %1887 = vmatpush3.bf16.msra.mxu0 %v2179_v20  ;;  %1909 = vmatpush3.bf16.msra.mxu1 %v2195_v31 }
 0x163   :  { %1888 = vmatprep.subr.bf16.mxu0 %v2180_v4  ;;  %1910 = vmatprep.subr.bf16.mxu1 %v2196_v32 }
 0x166   :  { %1889 = vmatpush3.bf16.msra.mxu0 %v2181_v22  ;;  %1911 = vmatpush3.bf16.msra.mxu1 %v2197_v33 }
 0x167   :  { %1890 = vmatprep.subr.bf16.mxu0 %v2182_v23  ;;  %1912 = vmatprep.subr.bf16.mxu1 %v2198_v34 }
 0x16a   :  { %1891 = vmatpush3.bf16.msra.mxu0 %v2183_v26  ;;  %1913 = vmatpush3.bf16.msra.mxu1 %v2199_v35 }
 0x16b   :  { %1892 = vmatprep.subr.bf16.mxu0 %v2184_v27  ;;  %1914 = vmatprep.subr.bf16.mxu1 %v2200_v36 }
 0x16e   :  { %1893 = vmatpush3.bf16.msra.mxu0 %v2185_v30  ;;  %1915 = vmatpush3.bf16.msra.mxu1 %v2201_v40 }
 0x1d1   :  { %v1197_v46 = vpop.f32.mrf.mxu0  ;;  %v1238_v47 = vpop.f32.mrf.mxu1 }
 0x1d2   :  { %v1198_v48 = vadd.f32 %v1197_v46, %v506_v44 }
 0x1d3   :  { %v1199_v49 = vpop.f32.mrf.mxu0  ;;  %v1240_v50 = vpop.f32.mrf.mxu1 }
 0x1d4   :  { %v1239_v51 = vadd.f32 %v1238_v47, %v1198_v48  ;;  %v1200_v52 = vadd.f32 %v1199_v49, %v510_v45 }
 0x1d5   :  { %v1201_v53 = vpop.f32.mrf.mxu0  ;;  %v1242_v54 = vpop.f32.mrf.mxu1 }
 0x1d6   :  { %v1241_v55 = vadd.f32 %v1240_v50, %v1200_v52  ;;  %v1327_v56 = vmax.f32 %v1239_v51, 0.0 }
 0x1d7   :  { %v1202_v57 = vpop.f32.mrf.mxu0  ;;  %v1243_v58 = vpop.f32.mrf.mxu1 }
 0x1d8   :  { %v1328_v59 = vmax.f32 %v1241_v55, 0.0  ;;  %v1331_v62 = vpack.c.bf16 %v1327_v56, %v1327_v56 }
 0x1da   :  { %v1332_v60 = vpack.c.bf16 %v1328_v59, %v1328_v59 }
 0x1dc   :  { %1630 = vmatprep.mubr.bf16.mxu0 %v1332_v60 }
 0x1dd   :  { %1631 = vmatmul.mubr.bf16.vlgmr.msra.gmra.mxu0 %v1331_v62 }
 0x211   :  { %v1279_v63 = vpop.f32.mrf.mxu0  ;;  %v1320_v0 = vpop.f32.mrf.mxu1 }
 0x212   :  { %v1280_v1 = vadd.f32 %v1279_v63, %v514_v38 }
 0x213   :  { %v1281_v2 = vpop.f32.mrf.mxu0  ;;  %v1322_v3 = vpop.f32.mrf.mxu1 }
 0x214   :  { %v1321_v5 = vadd.f32 %v1320_v0, %v1280_v1  ;;  %v1282_v6 = vadd.f32 %v1281_v2, %v518_v41 }
 0x215   :  { %v1283_v7 = vpop.f32.mrf.mxu0  ;;  %v1324_v8 = vpop.f32.mrf.mxu1 }
 0x216   :  { %v1323_v9 = vadd.f32 %v1322_v3, %v1282_v6  ;;  %v1329_v10 = vmax.f32 %v1321_v5, 0.0 }
 0x217   :  { %v1284_v11 = vpop.f32.mrf.mxu0  ;;  %v1325_v12 = vpop.f32.mrf.mxu1 }
 0x218   :  { %v1330_v13 = vmax.f32 %v1323_v9, 0.0  ;;  %v1333_v15 = vpack.c.bf16 %v1329_v10, %v1329_v10 }
 0x21a   :  { %v1334_v14 = vpack.c.bf16 %v1330_v13, %v1330_v13 }
 0x21c   :  { %1670 = vmatprep.mubr.bf16.mxu1 %v1334_v14 }
 0x21d   :  { %1671 = vmatmul.mubr.bf16.vlgmr.msra.gmra.mxu1 %v1333_v15 }
 0x29d   :  { %v1894_v37 = vpop.f32.mrf.mxu0 }
 0x29f   :  { %v1895_v39 = vpop.f32.mrf.mxu0 }
 0x2a0   :  { %v1896_v17 = vadd.f32 %v1895_v39, %v1894_v37 }
 0x2a1   :  { %v1897_v42 = vpop.f32.mrf.mxu0 }
 0x2a2   :  { %v1633_v4 = vadd.f32 %v1896_v17, %v1845_v18 }
 0x2a3   :  { %v1898_v16 = vpop.f32.mrf.mxu0 }
 0x2dd   :  { %v1916_v19 = vpop.f32.mrf.mxu1 }
 0x2df   :  { %v1917_v20 = vpop.f32.mrf.mxu1 }
 0x2e0   :  { %v1918_v61 = vadd.f32 %v1917_v20, %v1916_v19 }
 0x2e1   :  { %v1919_v21 = vpop.f32.mrf.mxu1 }
 0x2e2   :  { %v1673_v22 = vadd.f32 %v1918_v61, %v1633_v4 }
 0x2e3   :  { %v1920_v23 = vpop.f32.mrf.mxu1 }
 0x2e4   :  { %1678 = vst [vmem:[%s2375_s7] sm:$0xff] %v1673_v22 }
 0x2e5   :  { %1683 = vsyncpa [#allocation3], 1 }
 0x2e6   :  { %1684 = vsyncpa [#allocation5], 1 }

</bundles_post_ra>
